<compile_context>
chip_gen: v7x
topology: tpu7x:2x2x1
jax: 0.10.0
libtpu: 0.0.40
codegen_flags: <defaults>
</compile_context>

<pallas_src>
import numpy as np
import jax
import jax.numpy as jnp
from jax.experimental import pallas as pl
from jax.experimental.pallas import tpu as pltpu


# ---------------- fused Pallas kernel (entire forward) ----------------

def _make_fused_kernel(nc, p, hid, eps):
    """Fused kernel body for static layer count `nc`, pair count `p`, width `hid`."""

    def kernel(a_ref, w_ref, b_ref, x_ref, o_ref):
        a = a_ref[...]                       # (N, N)   bf16, node-permuted adjacency
        x = x_ref[...]                       # (N, HID) f32, node-permuted, zero-padded feats

        # Unrolled layer loop: PyG GraphConv(aggr='add', bias=True)
        #   y_i = W_rel @ (sum_{j->i} x_j) + W_root @ x_i + b ; ReLU.
        # Weights come from the packed bf16 slab via static sublane slices (32-aligned).
        for l in range(nc):
            w_rel = w_ref[(2 * l) * hid:(2 * l + 1) * hid, :]        # (HID, HID) bf16
            w_root = w_ref[(2 * l + 1) * hid:(2 * l + 2) * hid, :]   # (HID, HID) bf16
            b = b_ref[l:l + 1, :]                                    # (1, HID)   f32
            xb = x.astype(jnp.bfloat16)
            agg = jnp.dot(a, xb, preferred_element_type=jnp.float32)            # (N, HID)
            y = (jnp.dot(agg.astype(jnp.bfloat16), w_rel,
                         preferred_element_type=jnp.float32)
                 + jnp.dot(xb, w_root, preferred_element_type=jnp.float32)
                 + b)
            x = jnp.maximum(y, 0.0)                                              # (N, HID) f32

        # Pair split: nodes were pre-permuted (even first, odd second), so the torch
        # reshape(-1, 2*HID) split reduces to two static sublane slices.
        x1 = x[:p, :]                        # (P, HID) even nodes
        x2 = x[p:, :]                        # (P, HID) odd nodes
        d = x1 - x2
        out = jnp.sqrt(d * d + eps)          # (P, HID) f32

        # Head: Linear + sigmoid, explicit bf16 MXU operands / f32 accumulate.
        w_lin = w_ref[2 * nc * hid:(2 * nc + 1) * hid, :]            # (HID, HID) bf16, lane-padded
        b_lin = b_ref[nc:nc + 1, :]                                  # (1, HID)   f32, lane-padded
        logits = (jnp.dot(out.astype(jnp.bfloat16), w_lin,
                          preferred_element_type=jnp.float32) + b_lin)
        sig = jax.nn.sigmoid(logits)         # (P, HID), only the first OUT_C lanes meaningful

        # One lane-dense (P, 4*HID) output slab: [out | x1 | x2 | sig(padded)].
        o_ref[...] = jnp.concatenate([out, x1, x2, sig], axis=-1)

    return kernel


def make_forward(nc, in_c, hid, out_c, n, eps=1e-3):
    """Build the jitted fused forward for a static config / node count."""
    p = n // 2
    perm = jnp.asarray(np.concatenate([np.arange(0, n, 2), np.arange(1, n, 2)]),
                       dtype=jnp.int32)
    vmem = pl.BlockSpec(memory_space=pltpu.MemorySpace.VMEM)   # whole-array VMEM blocks
    call = pl.pallas_call(
        _make_fused_kernel(nc, p, hid, eps),
        in_specs=[vmem, vmem, vmem, vmem],
        out_specs=vmem,
        out_shape=jax.ShapeDtypeStruct((p, 4 * hid), jnp.float32),
    )
    # TODO(synk): to use both v7x TensorCores / amortize launch overhead, add a leading
    #   "parallel" grid axis over a batch of graphs instead of this grid-less call.
    # TODO(synk): for large N, tile the A row axis with a BlockSpec grid sized for v7x's
    #   64 MiB VMEM (keep A bf16 on v7x; int8 A storage is only valid on v5e/v6e).

    @jax.jit
    def forward(x, a_perm_bf16, w_slab, b_slab):
        # node permutation (even first) + zero-pad features to HID lanes, once per call
        xp = jnp.zeros((n, hid), jnp.float32).at[:, :in_c].set(x[perm])
        o = call(a_perm_bf16, w_slab, b_slab, xp)
        out = o[:, :hid]
        x1 = o[:, hid:2 * hid]
        x2 = o[:, 2 * hid:3 * hid]
        sig = o[:, 3 * hid:3 * hid + out_c]
        return sig, [out, x1, x2]

    return forward


# ---------------- one-time graph preprocessing (outside the per-forward path) --------

def build_permuted_adjacency(edge_index, n):
    """Dense aggregation matrix with the even/odd node permutation folded in (bf16)."""
    src = np.asarray(edge_index[0])
    dst = np.asarray(edge_index[1])
    A = np.zeros((n, n), np.float32)
    np.add.at(A, (dst, src), 1.0)            # A[i, j] = #edges j -> i (source_to_target)
    assert A.max() <= 256.0, "edge multiplicities > 256 are not exact in bf16"
    perm = np.concatenate([np.arange(0, n, 2), np.arange(1, n, 2)])
    Ap = A[np.ix_(perm, perm)]
    return jnp.asarray(Ap, dtype=jnp.bfloat16)


def pack_params(params, in_c, hid, out_c, nc):
    """Pack all matmul weights into one bf16 slab and all biases into one f32 slab."""
    blocks = []
    c_in = in_c
    for (w_rel, w_root, _) in params["convs"]:
        wr = jnp.zeros((hid, hid), jnp.float32).at[:c_in, :].set(w_rel.astype(jnp.float32))
        wo = jnp.zeros((hid, hid), jnp.float32).at[:c_in, :].set(w_root.astype(jnp.float32))
        blocks += [wr, wo]
        c_in = hid
    wl = jnp.zeros((hid, hid), jnp.float32).at[:, :out_c].set(
        params["w_lin"].astype(jnp.float32))
    blocks.append(wl)
    w_slab = jnp.concatenate(blocks, axis=0).astype(jnp.bfloat16)    # ((2nc+1)*hid, hid)

    bias_rows = [b for (_, _, b) in params["convs"]]
    bl = jnp.zeros((1, hid), jnp.float32).at[:, :out_c].set(params["b_lin"])
    b_slab = jnp.concatenate(bias_rows + [bl], axis=0)               # (nc+1, hid) f32
    return w_slab, b_slab


# ---------------- deterministic parameter init ----------------

def init_params(key, in_channels, hidden_channels, out_channels, nc):
    params = {"convs": []}
    c_in = in_channels
    for _ in range(nc):
        key, k1, k2, k3 = jax.random.split(key, 4)
        w_rel = (0.1 * jax.random.normal(k1, (c_in, hidden_channels), jnp.float32)
                 ).astype(jnp.bfloat16)
        w_root = (0.1 * jax.random.normal(k2, (c_in, hidden_channels), jnp.float32)
                  ).astype(jnp.bfloat16)
        b = 0.1 * jax.random.normal(k3, (1, hidden_channels), jnp.float32)
        params["convs"].append((w_rel, w_root, b))
        c_in = hidden_channels
    key, k1, k2 = jax.random.split(key, 3)
    params["w_lin"] = (0.1 * jax.random.normal(k1, (hidden_channels, out_channels),
                                               jnp.float32)).astype(jnp.bfloat16)
    params["b_lin"] = 0.1 * jax.random.normal(k2, (1, out_channels), jnp.float32)
    return params


# ---------------- pure-JAX reference (mirrors the torch module) ----------------

def _reference_forward(x, edge_index, params, hid, eps=1e-3):
    n = x.shape[0]
    src, dst = edge_index[0], edge_index[1]
    A = jnp.zeros((n, n), jnp.float32).at[dst, src].add(1.0)
    h = x
    for (w_rel, w_root, b) in params["convs"]:
        h = jax.nn.relu(A @ h @ w_rel.astype(jnp.float32)
                        + h @ w_root.astype(jnp.float32) + b)
    hr = h.reshape(-1, 2 * hid)
    x1, x2 = hr[:, :hid], hr[:, hid:]
    out = jnp.sqrt((x1 - x2) ** 2 + eps)
    sig = jax.nn.sigmoid(out @ params["w_lin"].astype(jnp.float32) + params["b_lin"])
    return sig, out, x1, x2


if __name__ == "__main__":
    IN_C, HID, OUT_C, NC = 4, 32, 2, 2
    N = 16                      # number of graph nodes (even -> N//2 pairs)
    P = N // 2

    key = jax.random.PRNGKey(0)
    key, kx = jax.random.split(key)
    x = jax.random.normal(kx, (N, IN_C), jnp.float32)

    # deterministic edge list (directed ring-ish graph)
    src_list, dst_list = [], []
    for i in range(N):
        src_list += [i, i]
        dst_list += [(i + 1) % N, (i + 3) % N]
    edge_index = jnp.asarray([src_list, dst_list], dtype=jnp.int32)
    batch = jnp.zeros((N,), dtype=jnp.int32)   # accepted by the module but unused

    params = init_params(key, IN_C, HID, OUT_C, NC)

    # one-time preprocessing, reused across forwards
    A_perm = build_permuted_adjacency(edge_index, N)
    w_slab, b_slab = pack_params(params, IN_C, HID, OUT_C, NC)

    forward = make_forward(NC, IN_C, HID, OUT_C, N)
    sig, (out, x1, x2) = forward(x, A_perm, w_slab, b_slab)
    jax.block_until_ready(sig)
    jax.block_until_ready(out)

    # correctness vs pure-JAX reference (bf16 MXU operands -> loose tolerance)
    sig_r, out_r, x1_r, x2_r = _reference_forward(x, edge_index, params, HID)
    np.testing.assert_allclose(np.asarray(out), np.asarray(out_r), atol=5e-2, rtol=5e-2)
    np.testing.assert_allclose(np.asarray(x1), np.asarray(x1_r), atol=5e-2, rtol=5e-2)
    np.testing.assert_allclose(np.asarray(x2), np.asarray(x2_r), atol=5e-2, rtol=5e-2)
    np.testing.assert_allclose(np.asarray(sig), np.asarray(sig_r), atol=5e-2, rtol=5e-2)

    assert sig.shape == (P, OUT_C) and out.shape == (P, HID)
    assert x1.shape == (P, HID) and x2.shape == (P, HID)
    print("KERNEL_OK")
</pallas_src>

<mosaic_0001>
module attributes {stable_mosaic.version = 11 : i64} {
  func.func @kernel(%arg0: memref<16x16xbf16, #tpu.memory_space<vmem>>, %arg1: memref<160x32xbf16, #tpu.memory_space<vmem>>, %arg2: memref<3x32xf32, #tpu.memory_space<vmem>>, %arg3: memref<16x32xf32, #tpu.memory_space<vmem>>, %arg4: memref<8x128xf32, #tpu.memory_space<vmem>>) attributes {dimension_semantics = [], scalar_prefetch = 0 : i64, scratch_operands = 0 : i64, tpu.core_type = #tpu.core_type<tc>} {
    %c0 = arith.constant 0 : index
    %c0_0 = arith.constant 0 : index
    %0 = vector.load %arg0[%c0, %c0_0] : memref<16x16xbf16, #tpu.memory_space<vmem>>, vector<16x16xbf16>
    %c0_1 = arith.constant 0 : index
    %c0_2 = arith.constant 0 : index
    %1 = vector.load %arg3[%c0_1, %c0_2] : memref<16x32xf32, #tpu.memory_space<vmem>>, vector<16x32xf32>
    %c0_3 = arith.constant 0 : index
    %c0_4 = arith.constant 0 : index
    %2 = vector.load %arg1[%c0_3, %c0_4] : memref<160x32xbf16, #tpu.memory_space<vmem>>, vector<32x32xbf16>
    %c32 = arith.constant 32 : index
    %c0_5 = arith.constant 0 : index
    %3 = vector.load %arg1[%c32, %c0_5] : memref<160x32xbf16, #tpu.memory_space<vmem>>, vector<32x32xbf16>
    %c0_6 = arith.constant 0 : index
    %c0_7 = arith.constant 0 : index
    %4 = vector.load %arg2[%c0_6, %c0_7] : memref<3x32xf32, #tpu.memory_space<vmem>>, vector<1x32xf32>
    %5 = arith.truncf %1 : vector<16x32xf32> to vector<16x32xbf16>
    %cst = arith.constant dense<0.000000e+00> : vector<16x32xf32>
    %6 = tpu.matmul %0, %5, %cst {dimension_numbers = #tpu.dot_dimension_numbers<[1], [0], [0], [1], [0, 0, 1, 1], [], []>} : vector<16x16xbf16>, vector<16x32xbf16>, vector<16x32xf32> -> vector<16x32xf32>
    %7 = arith.truncf %6 : vector<16x32xf32> to vector<16x32xbf16>
    %cst_8 = arith.constant dense<0.000000e+00> : vector<16x32xf32>
    %8 = tpu.matmul %7, %2, %cst_8 {dimension_numbers = #tpu.dot_dimension_numbers<[1], [0], [0], [1], [0, 0, 1, 1], [], []>} : vector<16x32xbf16>, vector<32x32xbf16>, vector<16x32xf32> -> vector<16x32xf32>
    %cst_9 = arith.constant dense<0.000000e+00> : vector<16x32xf32>
    %9 = tpu.matmul %5, %3, %cst_9 {dimension_numbers = #tpu.dot_dimension_numbers<[1], [0], [0], [1], [0, 0, 1, 1], [], []>} : vector<16x32xbf16>, vector<32x32xbf16>, vector<16x32xf32> -> vector<16x32xf32>
    %10 = arith.addf %8, %9 : vector<16x32xf32>
    %11 = vector.broadcast %4 : vector<1x32xf32> to vector<16x32xf32>
    %12 = arith.addf %10, %11 : vector<16x32xf32>
    %cst_10 = arith.constant 0.000000e+00 : f32
    %13 = vector.broadcast %cst_10 : f32 to vector<16x32xf32>
    %14 = arith.maximumf %12, %13 : vector<16x32xf32>
    %c64 = arith.constant 64 : index
    %c0_11 = arith.constant 0 : index
    %15 = vector.load %arg1[%c64, %c0_11] : memref<160x32xbf16, #tpu.memory_space<vmem>>, vector<32x32xbf16>
    %c96 = arith.constant 96 : index
    %c0_12 = arith.constant 0 : index
    %16 = vector.load %arg1[%c96, %c0_12] : memref<160x32xbf16, #tpu.memory_space<vmem>>, vector<32x32xbf16>
    %c1 = arith.constant 1 : index
    %c0_13 = arith.constant 0 : index
    %17 = vector.load %arg2[%c1, %c0_13] : memref<3x32xf32, #tpu.memory_space<vmem>>, vector<1x32xf32>
    %18 = arith.truncf %14 : vector<16x32xf32> to vector<16x32xbf16>
    %cst_14 = arith.constant dense<0.000000e+00> : vector<16x32xf32>
    %19 = tpu.matmul %0, %18, %cst_14 {dimension_numbers = #tpu.dot_dimension_numbers<[1], [0], [0], [1], [0, 0, 1, 1], [], []>} : vector<16x16xbf16>, vector<16x32xbf16>, vector<16x32xf32> -> vector<16x32xf32>
    %20 = arith.truncf %19 : vector<16x32xf32> to vector<16x32xbf16>
    %cst_15 = arith.constant dense<0.000000e+00> : vector<16x32xf32>
    %21 = tpu.matmul %20, %15, %cst_15 {dimension_numbers = #tpu.dot_dimension_numbers<[1], [0], [0], [1], [0, 0, 1, 1], [], []>} : vector<16x32xbf16>, vector<32x32xbf16>, vector<16x32xf32> -> vector<16x32xf32>
    %cst_16 = arith.constant dense<0.000000e+00> : vector<16x32xf32>
    %22 = tpu.matmul %18, %16, %cst_16 {dimension_numbers = #tpu.dot_dimension_numbers<[1], [0], [0], [1], [0, 0, 1, 1], [], []>} : vector<16x32xbf16>, vector<32x32xbf16>, vector<16x32xf32> -> vector<16x32xf32>
    %23 = arith.addf %21, %22 : vector<16x32xf32>
    %24 = vector.broadcast %17 : vector<1x32xf32> to vector<16x32xf32>
    %25 = arith.addf %23, %24 : vector<16x32xf32>
    %cst_17 = arith.constant 0.000000e+00 : f32
    %26 = vector.broadcast %cst_17 : f32 to vector<16x32xf32>
    %27 = arith.maximumf %25, %26 : vector<16x32xf32>
    %28 = vector.extract_strided_slice %27 {offsets = [0, 0], sizes = [8, 32], strides = [1, 1]} : vector<16x32xf32> to vector<8x32xf32>
    %29 = vector.extract_strided_slice %27 {offsets = [8, 0], sizes = [8, 32], strides = [1, 1]} : vector<16x32xf32> to vector<8x32xf32>
    %30 = arith.subf %28, %29 : vector<8x32xf32>
    %31 = arith.mulf %30, %30 : vector<8x32xf32>
    %cst_18 = arith.constant 1.000000e-03 : f32
    %32 = vector.broadcast %cst_18 : f32 to vector<8x32xf32>
    %33 = arith.addf %31, %32 : vector<8x32xf32>
    %34 = math.sqrt %33 : vector<8x32xf32>
    %c128 = arith.constant 128 : index
    %c0_19 = arith.constant 0 : index
    %35 = vector.load %arg1[%c128, %c0_19] : memref<160x32xbf16, #tpu.memory_space<vmem>>, vector<32x32xbf16>
    %c2 = arith.constant 2 : index
    %c0_20 = arith.constant 0 : index
    %36 = vector.load %arg2[%c2, %c0_20] : memref<3x32xf32, #tpu.memory_space<vmem>>, vector<1x32xf32>
    %37 = arith.truncf %34 : vector<8x32xf32> to vector<8x32xbf16>
    %cst_21 = arith.constant dense<0.000000e+00> : vector<8x32xf32>
    %38 = tpu.matmul %37, %35, %cst_21 {dimension_numbers = #tpu.dot_dimension_numbers<[1], [0], [0], [1], [0, 0, 1, 1], [], []>} : vector<8x32xbf16>, vector<32x32xbf16>, vector<8x32xf32> -> vector<8x32xf32>
    %39 = vector.broadcast %36 : vector<1x32xf32> to vector<8x32xf32>
    %40 = arith.addf %38, %39 : vector<8x32xf32>
    %41 = arith.negf %40 : vector<8x32xf32>
    %42 = math.exp %41 : vector<8x32xf32>
    %cst_22 = arith.constant 1.000000e+00 : f32
    %43 = vector.broadcast %cst_22 : f32 to vector<8x32xf32>
    %44 = arith.addf %43, %42 : vector<8x32xf32>
    %45 = arith.divf %43, %44 : vector<8x32xf32>
    %46 = tpu.concatenate %34, %28, %29, %45 in 1 : vector<8x32xf32>, vector<8x32xf32>, vector<8x32xf32>, vector<8x32xf32> -> vector<8x128xf32>
    %c0_23 = arith.constant 0 : index
    %c0_24 = arith.constant 0 : index
    %47 = vector.load %arg4[%c0_23, %c0_24] : memref<8x128xf32, #tpu.memory_space<vmem>>, vector<8x128xf32>
    tpu.vector_store %arg4[%c0_23, %c0_24], %46 {strides = array<i32>} : memref<8x128xf32, #tpu.memory_space<vmem>>, vector<8x128xf32>,
    return
  }
}

</mosaic_0001>

<bundles_post_ra>
// kernel: forward.1
= control target key start
LH: loop header
LB: loop body
LE: loop exit
PB: predicated region body
PF: predicated region fallthrough
CT: control target
= control target key end

     0   :  { %v594_v0 = vmov 0.0   ;;  %vm595_vm0 = vmmov 0   ;;  %vm37_vm1 = vcmask 130048   ;;  %vm95_vm2 = vcmask 261120   ;;  %s596_s17 = smov 32   ;;  %s598_s20 = smov 96   ;;  %s709_s3 = inlined_call_operand.vmem [shape: f32[16,32], index: 3, kind: input, shape index: {}]   ;;  %s710_s0 = inlined_call_operand.vmem [shape: bf16[16,16], index: 0, kind: input, shape index: {}]   ;;  %s711_s1 = inlined_call_operand.vmem [shape: bf16[160,32], index: 1, kind: input, shape index: {}]   ;;  %s712_s2 = inlined_call_operand.vmem [shape: f32[3,32], index: 2, kind: input, shape index: {}]   ;;  %s713_s4 = inlined_call_operand.vmem [shape: f32[8,128], index: 4, kind: output, shape index: {}]  }
   0x1   :  { %520 = vmatprep.subr.bf16.mxu0 %v594_v0  ;;  %v20_v1 = vld [vmem:[%s709_s3] sm:$0xff]  ;;  %v21_v2 = vld [vmem:[%s709_s3 + $0x8] sm:$0xff]  ;;  %522 = vmatprep.mubr.msk.bf16.mxu0 %vm595_vm0, %v594_v0  ;;  %v578_v5 = vld [vmem:[%s711_s1 + $0x10] sm:$0xff]   ;;  %vm470_vm5 = vcmask 523264   ;;  %vm472_vm6 = vcmask 785408  }
   0x2   :  { %v31_v3 = vpack.c.bf16 %v21_v2, %v20_v1  ;;  %v577_v4 = vld [vmem:[%s710_s0] sm:$0xff]   ;;  %526 = vmatprep.subr.bf16.mxu1 %v594_v0  ;;  %530 = vmatprep.mubr.msk.bf16.mxu1 %vm595_vm0, %v594_v0  ;;  %v580_v7 = vld [vmem:[%s711_s1 + $0x18] sm:$0xff]   ;;  %v581_v8 = vld [vmem:[%s711_s1 + $0x8] sm:$0xff]  }
   0x3   :  { %v579_v6 = vld [vmem:[%s711_s1] sm:$0xff]   ;;  %527 = vmatpush3.bf16.msra.mxu1 %v578_v5  ;;  %v582_v18 = vld [vmem:[%s711_s1 + $0x30] sm:$0xff]   ;;  %v583_v19 = vld [vmem:[%s711_s1 + $0x38] sm:$0xff]  }
   0x4   :  { %521 = vmatpush3.bf16.msra.mxu0 %v31_v3  ;;  %528 = vmatprep.subr.bf16.mxu1 %v594_v0  ;;  %v487_v20 = vld [vmem:[%s712_s2] ss:$0 sm:$0xff]  ;;  %v585_v33 = vld [vmem:[%s711_s1 + $0x28] sm:$0xff]   ;;  %v495_v46 = vld [vmem:[%s712_s2 + $0x1] ss:$0 sm:$0xff] }
   0x5   :  { %534 = vmatprep.subr.bf16.mxu0 %v594_v0  ;;  %v584_v32 = vld [vmem:[%s711_s1 + $0x20] sm:$0xff]   ;;  %v587_v44 = vld [vmem:[%s711_s1 + $0x48] sm:$0xff]  }
   0x6   :  { %v586_v43 = vld [vmem:[%s711_s1 + $0x40] sm:$0xff]   ;;  %s597_s1 = smov 64  }
   0x7   :  { %523 = vmatmul.mubr.msk.bf16.vlgmr.msra.gmra.mrb[0].mxu0 %vm37_vm1, %v577_v4  ;;  %529 = vmatpush3.bf16.msra.mxu1 %v580_v7  ;;  %v496_v1 = vld [vmem:[%s712_s2 + $0x2] ss:$0 sm:$0xff] }
   0x8   :  { %535 = vmatpush3.bf16.msra.mxu0 %v579_v6  ;;  %538 = vmatprep.mubr.msk.bf16.mxu0 %vm595_vm0, %v594_v0 }
   0x9   :  { %536 = vmatprep.subr.bf16.mxu0 %v594_v0  ;;  %542 = vmatprep.subr.bf16.mxu1 %v594_v0 }
   0xa   :  { %531 = vmatmul.mubr.msk.bf16.vlgmr.msra.gmra.mrb[0].mxu1 %vm95_vm2, %v31_v3 }
   0xb   :  { %544 = vmatprep.mubr.msk.bf16.mxu1 %vm595_vm0, %v594_v0 }
   0xc   :  { %537 = vmatpush3.bf16.msra.mxu0 %v581_v8 }
   0xd   :  { %548 = vmatprep.subr.bf16.mxu0 %v594_v0 }
  0xda   :  { %v75_v9 = vpop.f32.mrb[0].mxu0 }
  0xdb   :  { %v524_v10 = vpop.f32.mrb[1].mxu0 }
  0xdc   :  { %v78_v11 = vpop.f32.mrb[2].mxu0 }
  0xdd   :  { %v82_v12 = vpack.c.bf16 %v78_v11, %v75_v9  ;;  %v525_v13 = vpop.f32.mrb[3].mxu0  ;;  %v133_v14 = vpop.f32.mrb[0].mxu1 }
  0xde   :  { %v532_v15 = vpop.f32.mrb[1].mxu1 }
  0xdf   :  { %539 = vmatmul.mubr.msk.bf16.vlgmr.msra.gmra.mrb[4].mxu0 %vm95_vm2, %v82_v12  ;;  %v136_v16 = vpop.f32.mrb[2].mxu1 }
  0xe0   :  { %552 = vmatprep.mubr.msk.bf16.mxu0 %vm595_vm0, %v594_v0  ;;  %v533_v17 = vpop.f32.mrb[3].mxu1  ;;  %549 = vmatpush3.bf16.msra.mxu0 %v582_v18 }
  0xe1   :  { %550 = vmatprep.subr.bf16.mxu0 %v594_v0 }
  0xe4   :  { %551 = vmatpush3.bf16.msra.mxu0 %v583_v19 }
  0xe5   :  { %564 = vmatprep.subr.bf16.mxu0 %v594_v0 }
 0x1b2   :  { %v189_v21 = vpop.f32.mrb[4].mxu0 }
 0x1b3   :  { %v190_v22 = vadd.f32 %v189_v21, %v133_v14  ;;  %v540_v23 = vpop.f32.mrb[5].mxu0 }
 0x1b4   :  { %v192_v24 = vpop.f32.mrb[6].mxu0 }
 0x1b5   :  { %v200_v25 = vadd.f32 %v487_v20, %v190_v22  ;;  %v193_v26 = vadd.f32 %v192_v24, %v136_v16  ;;  %v541_v27 = vpop.f32.mrb[7].mxu0 }
 0x1b7   :  { %v201_v28 = vadd.f32 %v487_v20, %v193_v26  ;;  %v202_v29 = vmax.f32 %v200_v25, 0.0 }
 0x1b9   :  { %v203_v30 = vmax.f32 %v201_v28, 0.0 }
 0x1bb   :  { %v213_v31 = vpack.c.bf16 %v203_v30, %v202_v29 }
 0x1bd   :  { %543 = vmatpush3.bf16.msra.mxu1 %v213_v31  ;;  %553 = vmatmul.mubr.msk.bf16.vlgmr.msra.gmra.mrb[8].mxu0 %vm95_vm2, %v213_v31 }
 0x1be   :  { %556 = vmatprep.subr.bf16.mxu1 %v594_v0  ;;  %568 = vmatprep.mubr.msk.bf16.mxu0 %vm595_vm0, %v594_v0 }
 0x1bf   :  { %565 = vmatpush3.bf16.msra.mxu0 %v586_v43 }
 0x1c0   :  { %545 = vmatmul.mubr.msk.bf16.vlgmr.msra.gmra.mrb[4].mxu1 %vm37_vm1, %v577_v4  ;;  %566 = vmatprep.subr.bf16.mxu0 %v594_v0 }
 0x1c1   :  { %560 = vmatprep.mubr.msk.bf16.mxu1 %vm595_vm0, %v594_v0  ;;  %557 = vmatpush3.bf16.msra.mxu1 %v584_v32 }
 0x1c2   :  { %558 = vmatprep.subr.bf16.mxu1 %v594_v0 }
 0x1c3   :  { %567 = vmatpush3.bf16.msra.mxu0 %v587_v44 }
 0x1c5   :  { %559 = vmatpush3.bf16.msra.mxu1 %v585_v33 }
 0x290   :  { %v305_v34 = vpop.f32.mrb[8].mxu0 }
 0x291   :  { %v554_v35 = vpop.f32.mrb[9].mxu0 }
 0x292   :  { %v308_v36 = vpop.f32.mrb[10].mxu0 }
 0x293   :  { %v248_v37 = vpop.f32.mrb[4].mxu1  ;;  %v555_v38 = vpop.f32.mrb[11].mxu0 }
 0x294   :  { %v546_v39 = vpop.f32.mrb[5].mxu1 }
 0x295   :  { %v251_v40 = vpop.f32.mrb[6].mxu1 }
 0x296   :  { %v255_v41 = vpack.c.bf16 %v251_v40, %v248_v37  ;;  %v547_v42 = vpop.f32.mrb[7].mxu1 }
 0x298   :  { %561 = vmatmul.mubr.msk.bf16.vlgmr.msra.gmra.mrb[8].mxu1 %vm95_vm2, %v255_v41 }
 0x36b   :  { %v361_v45 = vpop.f32.mrb[8].mxu1 }
 0x36c   :  { %v362_v47 = vadd.f32 %v361_v45, %v305_v34  ;;  %v562_v48 = vpop.f32.mrb[9].mxu1 }
 0x36d   :  { %v364_v49 = vpop.f32.mrb[10].mxu1 }
 0x36e   :  { %v365_v50 = vadd.f32 %v364_v49, %v308_v36  ;;  %v563_v51 = vpop.f32.mrb[11].mxu1  ;;  %v372_v52 = vadd.f32 %v495_v46, %v362_v47 }
 0x370   :  { %v373_v53 = vadd.f32 %v495_v46, %v365_v50  ;;  %v374_v54 = vmax.f32 %v372_v52, 0.0 }
 0x372   :  { %v375_v55 = vmax.f32 %v373_v53, 0.0  ;;  %458 = vrot.lane.b32.xlu0 %v374_v54, %s596_s17 }
 0x374   :  { %v376_v56 = vsub.f32 %v374_v54, %v375_v55 }
 0x376   :  { %v377_v57 = vmul.f32 %v376_v56, %v376_v56  ;;  %462 = vrot.lane.b32.xlu0 %v375_v55, %s597_s1 }
 0x378   :  { %v378_v58 = vadd.f32 0.001, %v377_v57 }
 0x37a   :  { %588 = vrsqrt.f32 %v378_v58  ;;  %vm381_vm3 = vcmp.eq.f32.partialorder %v378_v58, inf  ;;  %v384_v61 = vand.u32 2147483648, %v378_v58  ;;  %vm383_vm4 = vcmp.eq.f32.partialorder %v378_v58, 0.0 }
 0x384   :  { %v589_v59 = vpop.eup %588 }
 0x385   :  { %v380_v60 = vmul.f32 %v589_v59, %v378_v58 }
 0x387   :  { %v382_v62 = vsel %vm381_vm3, %v378_v58, %v380_v60 }
 0x388   :  { %v385_v63 = vsel %vm383_vm4, %v384_v61, %v382_v62 }
 0x389   :  { %v391_v0 = vpack.c.bf16 %v385_v63, %v385_v63 }
 0x38b   :  { %569 = vmatmul.mubr.msk.bf16.vlgmr.msra.gmra.mrb[12].mxu0 %vm95_vm2, %v391_v0 }
 0x3e4   :  { %v459_v11 = vpop.permute.xlu0 %458 }
 0x3e5   :  { %v469_v13 = vsel %vm95_vm2, %v385_v63, %v459_v11 }
 0x3e8   :  { %v463_v12 = vpop.permute.xlu0 %462 }
 0x3e9   :  { %v471_v14 = vsel %vm470_vm5, %v469_v13, %v463_v12 }
 0x45e   :  { %v445_v2 = vpop.f32.mrb[12].mxu0 }
 0x45f   :  { %v446_v3 = vadd.f32 %v496_v1, %v445_v2  ;;  %v570_v4 = vpop.f32.mrb[13].mxu0 }
 0x460   :  { %v448_v5 = vpop.f32.mrb[14].mxu0 }
 0x461   :  { %v500_v6 = vmul.f32 -1.442695, %v446_v3  ;;  %v571_v7 = vpop.f32.mrb[15].mxu0 }
 0x463   :  { %590 = vpow2.f32 %v500_v6 }
 0x46d   :  { %v591_v8 = vpop.eup %590 }
 0x46e   :  { %v454_v9 = vadd.f32 1.0, %v591_v8 }
 0x470   :  { %592 = vrcp.f32 %v454_v9 }
 0x47a   :  { %v593_v10 = vpop.eup %592 }
 0x47b   :  { %466 = vrot.lane.b32.xlu1 %v593_v10, %s598_s20 }
 0x4ed   :  { %v467_v15 = vpop.permute.xlu1 %466 }
 0x4ee   :  { %v473_v16 = vsel %vm472_vm6, %v471_v14, %v467_v15 }
 0x4ef   :  { %474 = vst [vmem:[%s713_s4] sm:$0xff] %v473_v16 }

</bundles_post_ra>
